<compile_context>
chip_gen: v7x
topology: tpu7x:2x2x1
jax: 0.10.0
libtpu: 0.0.40
codegen_flags: <defaults>
</compile_context>

<pallas_src>
import functools

import jax
import jax.numpy as jnp
import numpy as np
from jax.experimental import pallas as pl
from jax.experimental.pallas import tpu as pltpu


# ----------------------------------------------------------------------------
# helpers
# ----------------------------------------------------------------------------
def _auto_tile(dim: int, unit: int, cap: int) -> int:
    """Largest tile <= cap that is a multiple of `unit` and evenly divides `dim`.
    Falls back to the full dimension (always a legal block size)."""
    if dim % unit != 0:
        return dim
    t = min(cap - cap % unit, dim)
    while t >= unit:
        if dim % t == 0:
            return t
        t -= unit
    return dim


def get_sinusoid_encoding_table(n_position, d_hid):
    """Matches model/vit_ours.py::get_sinusoid_encoding_table (deterministic)."""
    def get_position_angle_vec(position):
        return [position / np.power(10000, 2 * (hid_j // 2) / d_hid)
                for hid_j in range(d_hid)]
    table = np.array([get_position_angle_vec(p) for p in range(n_position)])
    table[:, 0::2] = np.sin(table[:, 0::2])
    table[:, 1::2] = np.cos(table[:, 1::2])
    return jnp.asarray(table[None, ...], dtype=jnp.float32)


# ----------------------------------------------------------------------------
# Pallas kernels
# ----------------------------------------------------------------------------
def _matmul_bias_act_kernel(x_ref, w_ref, b_ref, o_ref, *, activation):
    # bf16 MXU inputs, f32 accumulation; bias broadcast from a (1, tn) block.
    acc = jnp.dot(x_ref[...], w_ref[...], preferred_element_type=jnp.float32)
    acc = acc + b_ref[...]
    if activation == "gelu":
        # TODO(synk): PyTorch nn.GELU defaults to the exact erf form; the tanh
        # approximation is used here for portable Mosaic lowering.
        acc = jax.nn.gelu(acc, approximate=True)
    o_ref[...] = acc.astype(o_ref.dtype)


def _layernorm_kernel(x_ref, g_ref, b_ref, o_ref, *, eps):
    x = x_ref[...].astype(jnp.float32)
    mu = jnp.mean(x, axis=-1, keepdims=True)
    xc = x - mu
    var = jnp.mean(xc * xc, axis=-1, keepdims=True)
    y = xc * jax.lax.rsqrt(var + eps)
    o_ref[...] = (y * g_ref[...] + b_ref[...]).astype(o_ref.dtype)


def _attention_kernel(q_ref, k_ref, v_ref, o_ref, *, scale):
    # One batch element per grid step; all heads at once. Mask is None (eval path).
    q = q_ref[0].astype(jnp.float32) * scale            # (H, N, Dh)
    k = k_ref[0].astype(jnp.float32)
    v = v_ref[0].astype(jnp.float32)
    s = jnp.einsum("hqd,hkd->hqk", q, k, preferred_element_type=jnp.float32)
    s = s - jnp.max(s, axis=-1, keepdims=True)
    p = jnp.exp(s)
    p = p / jnp.sum(p, axis=-1, keepdims=True)
    o = jnp.einsum("hqk,hkd->hqd", p, v, preferred_element_type=jnp.float32)
    o_ref[0] = o.astype(o_ref.dtype)


# ----------------------------------------------------------------------------
# Pallas wrappers
# ----------------------------------------------------------------------------
def patch_embed_forward(x, weight, bias, *, tubelet_size, patch_size,
                        tile_m=None, tile_n=None):
    """x: (B, C, T, H, W); weight: (E, C, tub, p, p); bias: (E,). Returns (B, NP, E)."""
    B, C, T, H, W = x.shape
    E = weight.shape[0]
    tub, p = tubelet_size, patch_size
    Tp, Hp, Wp = T // tub, H // p, W // p
    NP = Tp * Hp * Wp
    K = C * tub * p * p
    M = B * NP

    # kernel==stride Conv3d is an exact matmul on (c, kt, kh, kw)-flattened patches.
    # Patch extraction is a layout-only reshape/transpose, done in bf16 to halve the
    # HBM traffic of that copy.
    # TODO(synk): fuse this extraction into the kernel via a (B, Tp, Hp)-grid index_map
    # over the raw NCTHW tensor to remove this extra HBM read+write of x entirely.
    xp = x.astype(jnp.bfloat16).reshape(B, C, Tp, tub, Hp, p, Wp, p)
    xp = xp.transpose(0, 2, 4, 6, 1, 3, 5, 7)
    patches = xp.reshape(M, K)                                 # (M, K) bf16
    w2d = weight.reshape(E, K).T.astype(jnp.bfloat16)          # (K, E) bf16
    b2d = bias.reshape(1, E).astype(jnp.float32)               # (1, E) f32

    # 256-capped tiles match the v6e/v7x 256x256 MXU; the double-buffered footprint
    # 2*(tm*K + K*tn + tm*tn) in bf16 stays far below v7x's 64 MiB VMEM (raise
    # vmem_limit_bytes only if K grows much larger). K stays un-tiled -> no accumulator.
    tm = tile_m if tile_m is not None else _auto_tile(M, 8, 256)
    tn = tile_n if tile_n is not None else _auto_tile(E, 128, 256)
    grid = (pl.cdiv(M, tm), pl.cdiv(E, tn))

    cost = pl.CostEstimate(
        flops=2 * M * K * E,
        transcendentals=0,
        bytes_accessed=int(M * K * 2 + K * E * 2 + E * 4 + M * E * x.dtype.itemsize),
    )

    out = pl.pallas_call(
        functools.partial(_matmul_bias_act_kernel, activation=None),
        out_shape=jax.ShapeDtypeStruct((M, E), x.dtype),
        grid=grid,
        in_specs=[
            pl.BlockSpec((tm, K), lambda i, j: (i, 0)),
            pl.BlockSpec((K, tn), lambda i, j: (0, j)),
            pl.BlockSpec((1, tn), lambda i, j: (0, j)),
        ],
        out_specs=pl.BlockSpec((tm, tn), lambda i, j: (i, j)),
        compiler_params=pltpu.CompilerParams(
            # Both axes independent -> shard row/col tiles across v7x's 2 TensorCores.
            dimension_semantics=("parallel", "parallel"),
        ),
        cost_estimate=cost,
    )(patches, w2d, b2d)
    return out.reshape(B, NP, E)


def linear_pallas(x2d, w, b=None, *, activation=None, tile_n=128):
    """y = act(x @ w + b). x2d: (M, K); w: (K, O); b: (O,) or None (qkv_bias=False)."""
    M, K = x2d.shape
    O = w.shape[1]
    xb = x2d.astype(jnp.bfloat16)
    wb = w.astype(jnp.bfloat16)
    bf = (jnp.zeros((O,), jnp.float32) if b is None
          else b.astype(jnp.float32)).reshape(1, O)
    tn = tile_n if O % tile_n == 0 else O
    return pl.pallas_call(
        functools.partial(_matmul_bias_act_kernel, activation=activation),
        out_shape=jax.ShapeDtypeStruct((M, O), x2d.dtype),
        grid=(O // tn,),
        in_specs=[
            pl.BlockSpec((M, K), lambda j: (0, 0)),
            pl.BlockSpec((K, tn), lambda j: (0, j)),
            pl.BlockSpec((1, tn), lambda j: (0, j)),
        ],
        out_specs=pl.BlockSpec((M, tn), lambda j: (0, j)),
        compiler_params=pltpu.CompilerParams(dimension_semantics=("parallel",)),
    )(xb, wb, bf)


def layernorm_pallas(x2d, gamma, beta, *, eps=1e-5):
    M, E = x2d.shape
    tm = _auto_tile(M, 8, 512)
    return pl.pallas_call(
        functools.partial(_layernorm_kernel, eps=eps),
        out_shape=jax.ShapeDtypeStruct((M, E), x2d.dtype),
        grid=(pl.cdiv(M, tm),),
        in_specs=[
            pl.BlockSpec((tm, E), lambda i: (i, 0)),
            pl.BlockSpec((1, E), lambda i: (0, 0)),
            pl.BlockSpec((1, E), lambda i: (0, 0)),
        ],
        out_specs=pl.BlockSpec((tm, E), lambda i: (i, 0)),
        compiler_params=pltpu.CompilerParams(dimension_semantics=("parallel",)),
    )(x2d, gamma.reshape(1, E), beta.reshape(1, E))


def attention_core_pallas(q, k, v, *, scale):
    """softmax(scale * q k^T) v. q, k, v: (B, H, N, Dh)."""
    B, H, N, Dh = q.shape
    spec = pl.BlockSpec((1, H, N, Dh), lambda b: (b, 0, 0, 0))
    return pl.pallas_call(
        functools.partial(_attention_kernel, scale=scale),
        out_shape=jax.ShapeDtypeStruct((B, H, N, Dh), q.dtype),
        grid=(B,),
        in_specs=[spec, spec, spec],
        out_specs=spec,
        compiler_params=pltpu.CompilerParams(dimension_semantics=("parallel",)),
    )(q, k, v)


# ----------------------------------------------------------------------------
# model forward (mirrors PretrainVisionTransformer.forward, eval mode)
# ----------------------------------------------------------------------------
def attention_forward(x, p, num_heads):
    B, N, E = x.shape
    head_dim = E // num_heads
    scale = head_dim ** -0.5
    qkv = linear_pallas(x.reshape(B * N, E), p["qkv_w"], None)          # no qkv bias
    qkv = qkv.reshape(B, N, 3, num_heads, head_dim).transpose(2, 0, 3, 1, 4)
    q, k, v = qkv[0], qkv[1], qkv[2]                                     # (B, H, N, Dh)
    o = attention_core_pallas(q, k, v, scale=scale)
    o = o.transpose(0, 2, 1, 3).reshape(B * N, E)
    o = linear_pallas(o, p["proj_w"], p["proj_b"])
    return o.reshape(B, N, E)


def block_forward(x, p, num_heads):
    # drop / attn_drop / drop_path rates are 0 -> identity; init_values=0.0 -> no gammas.
    B, N, E = x.shape
    h = layernorm_pallas(x.reshape(B * N, E), p["ln1_g"], p["ln1_b"]).reshape(B, N, E)
    x = x + attention_forward(h, p, num_heads)
    h = layernorm_pallas(x.reshape(B * N, E), p["ln2_g"], p["ln2_b"])
    h = linear_pallas(h, p["fc1_w"], p["fc1_b"], activation="gelu")
    h = linear_pallas(h, p["fc2_w"], p["fc2_b"]).reshape(B, N, E)
    return x + h


def pretrain_vit_forward(x, params, cfg):
    """PretrainVisionTransformer.forward: x (B, T, C, H, W) -> cls embedding (B, E)."""
    B = x.shape[0]
    E = cfg["embed_dim"]
    x = jnp.transpose(x, (0, 2, 1, 3, 4))                   # -> (B, C, T, H, W)
    tok = patch_embed_forward(x, params["patch_w"], params["patch_b"],
                              tubelet_size=cfg["tubelet_size"],
                              patch_size=cfg["patch_size"])
    pos = params["pos_embed"].astype(tok.dtype)
    tok = tok + pos[:, 1:, :]
    cls_tok = jnp.broadcast_to(params["cls_token"] + pos[:, :1, :], (B, 1, E))
    h = jnp.concatenate([cls_tok, tok], axis=1)             # (B, NP+1, E)
    # TODO(synk): PatchDropout training-mode token drop / attention mask skipped
    # (eval-mode identity path, mask=None).
    for blk in params["blocks"]:
        h = block_forward(h, blk, cfg["num_heads"])
    B_, N, _ = h.shape
    h = layernorm_pallas(h.reshape(B_ * N, E), params["norm_g"], params["norm_b"])
    h = h.reshape(B_, N, E)
    # head = Identity (encoder_num_classes=0); _global_pool -> (x[:,0], x[:,1:]);
    # the top-level forward returns the cls part only.
    return h[:, 0]


# ----------------------------------------------------------------------------
# pure-JAX reference (mirrors the kernels' bf16-input / f32-accumulation math)
# ----------------------------------------------------------------------------
def _mm_ref(x, w, b=None):
    y = jnp.dot(x.astype(jnp.bfloat16), w.astype(jnp.bfloat16),
                preferred_element_type=jnp.float32)
    if b is not None:
        y = y + b.astype(jnp.float32)
    return y


def _ln_ref(x, g, b, eps=1e-5):
    x = x.astype(jnp.float32)
    mu = jnp.mean(x, axis=-1, keepdims=True)
    xc = x - mu
    var = jnp.mean(xc * xc, axis=-1, keepdims=True)
    return xc * jax.lax.rsqrt(var + eps) * g + b


def reference_patch_embed(x, weight, bias, *, tubelet_size, patch_size):
    B, C, T, H, W = x.shape
    E = weight.shape[0]
    tub, p = tubelet_size, patch_size
    Tp, Hp, Wp = T // tub, H // p, W // p
    K = C * tub * p * p
    xp = x.astype(jnp.bfloat16).reshape(B, C, Tp, tub, Hp, p, Wp, p)
    xp = xp.transpose(0, 2, 4, 6, 1, 3, 5, 7).reshape(B * Tp * Hp * Wp, K)
    return _mm_ref(xp, weight.reshape(E, K).T, bias).reshape(B, Tp * Hp * Wp, E)


def reference_forward(x, params, cfg):
    B = x.shape[0]
    E = cfg["embed_dim"]
    H = cfg["num_heads"]
    hi = jax.lax.Precision.HIGHEST
    x = jnp.transpose(x, (0, 2, 1, 3, 4))
    tok = reference_patch_embed(x, params["patch_w"], params["patch_b"],
                                tubelet_size=cfg["tubelet_size"],
                                patch_size=cfg["patch_size"])
    pos = params["pos_embed"]
    tok = tok + pos[:, 1:, :]
    cls_tok = jnp.broadcast_to(params["cls_token"] + pos[:, :1, :], (B, 1, E))
    h = jnp.concatenate([cls_tok, tok], axis=1)
    N = h.shape[1]
    Dh = E // H
    scale = Dh ** -0.5
    for p in params["blocks"]:
        y = _ln_ref(h.reshape(B * N, E), p["ln1_g"], p["ln1_b"])
        qkv = _mm_ref(y, p["qkv_w"]).reshape(B, N, 3, H, Dh).transpose(2, 0, 3, 1, 4)
        q, k, v = qkv[0] * scale, qkv[1], qkv[2]
        s = jnp.einsum("bhqd,bhkd->bhqk", q, k, precision=hi)
        s = s - jnp.max(s, axis=-1, keepdims=True)
        a = jnp.exp(s)
        a = a / jnp.sum(a, axis=-1, keepdims=True)
        o = jnp.einsum("bhqk,bhkd->bhqd", a, v, precision=hi)
        o = o.transpose(0, 2, 1, 3).reshape(B * N, E)
        h = h + _mm_ref(o, p["proj_w"], p["proj_b"]).reshape(B, N, E)
        y = _ln_ref(h.reshape(B * N, E), p["ln2_g"], p["ln2_b"])
        y = jax.nn.gelu(_mm_ref(y, p["fc1_w"], p["fc1_b"]), approximate=True)
        h = h + _mm_ref(y, p["fc2_w"], p["fc2_b"]).reshape(B, N, E)
    h = _ln_ref(h.reshape(B * N, E), params["norm_g"], params["norm_b"]).reshape(B, N, E)
    return h[:, 0]


# ----------------------------------------------------------------------------
# synthetic parameter init (deterministic; not a checkpoint)
# ----------------------------------------------------------------------------
def init_params(key, cfg):
    E = cfg["embed_dim"]
    C = cfg["in_chans"]
    tub = cfg["tubelet_size"]
    ps = cfg["patch_size"]
    depth = cfg["depth"]
    hidden = int(E * cfg["mlp_ratio"])
    keys = jax.random.split(key, 3 + depth)

    def nrm(k, shape, s=0.02):
        return jax.random.normal(k, shape, dtype=jnp.float32) * s

    params = {
        "patch_w": nrm(keys[0], (E, C, tub, ps, ps)),          # Conv3d weight layout
        "patch_b": nrm(keys[1], (E,)),
        "cls_token": nrm(keys[2], (1, 1, E)),
        "pos_embed": get_sinusoid_encoding_table(cfg["num_patches"] + 1, E),
        "norm_g": jnp.ones((E,), jnp.float32),
        "norm_b": jnp.zeros((E,), jnp.float32),
        "blocks": [],
    }
    for d in range(depth):
        bk = jax.random.split(keys[3 + d], 7)
        params["blocks"].append({
            "ln1_g": jnp.ones((E,), jnp.float32),
            "ln1_b": jnp.zeros((E,), jnp.float32),
            "qkv_w": nrm(bk[0], (E, 3 * E)),                   # stored (in, out); no bias
            "proj_w": nrm(bk[1], (E, E)),
            "proj_b": nrm(bk[2], (E,)),
            "ln2_g": jnp.ones((E,), jnp.float32),
            "ln2_b": jnp.zeros((E,), jnp.float32),
            "fc1_w": nrm(bk[3], (E, hidden)),
            "fc1_b": nrm(bk[4], (hidden,)),
            "fc2_w": nrm(bk[5], (hidden, E)),
            "fc2_b": nrm(bk[6], (E,)),
        })
    return params


if __name__ == "__main__":
    cfg = dict(
        img_size=16, patch_size=8, in_chans=3, num_frames=4, tubelet_size=2,
        embed_dim=128, depth=2, num_heads=4, mlp_ratio=4.0,
    )
    cfg["num_patches"] = ((cfg["img_size"] // cfg["patch_size"]) ** 2
                          * (cfg["num_frames"] // cfg["tubelet_size"]))
    B = 2

    key = jax.random.PRNGKey(0)
    kx, kp = jax.random.split(key)
    # PretrainVisionTransformer.forward input layout: (B, T, C, H, W)
    x = jax.random.normal(
        kx, (B, cfg["num_frames"], cfg["in_chans"], cfg["img_size"], cfg["img_size"]),
        dtype=jnp.float32)
    params = init_params(kp, cfg)

    # --- standalone patch-embed check on a forced multi-step (2, 1) grid ---
    x_ncthw = jnp.transpose(x, (0, 2, 1, 3, 4))
    pe = patch_embed_forward(x_ncthw, params["patch_w"], params["patch_b"],
                             tubelet_size=cfg["tubelet_size"],
                             patch_size=cfg["patch_size"],
                             tile_m=8, tile_n=128)
    pe = jax.block_until_ready(pe)
    pe_ref = reference_patch_embed(x_ncthw, params["patch_w"], params["patch_b"],
                                   tubelet_size=cfg["tubelet_size"],
                                   patch_size=cfg["patch_size"])
    assert pe.shape == (B, cfg["num_patches"], cfg["embed_dim"])
    assert jnp.allclose(pe, pe_ref, atol=1e-2, rtol=1e-2)

    # --- full PretrainVisionTransformer forward (returns the cls embedding) ---
    fwd = jax.jit(lambda xx, pp: pretrain_vit_forward(xx, pp, cfg))
    out = jax.block_until_ready(fwd(x, params))
    ref = reference_forward(x, params, cfg)
    assert out.shape == (B, cfg["embed_dim"])
    assert jnp.allclose(out, ref, atol=1e-2, rtol=1e-2)

    print("KERNEL_OK")
</pallas_src>

<mosaic_0001>
module attributes {stable_mosaic.version = 11 : i64} {
  func.func @_matmul_bias_act_kernel(%arg0: i32, %arg1: i32, %arg2: memref<8x384xbf16, #tpu.memory_space<vmem>>, %arg3: memref<384x128xbf16, #tpu.memory_space<vmem>>, %arg4: memref<1x128xf32, #tpu.memory_space<vmem>>, %arg5: memref<8x128xf32, #tpu.memory_space<vmem>>) attributes {dimension_semantics = [#tpu.dimension_semantics<parallel>, #tpu.dimension_semantics<parallel>], iteration_bounds = array<i64: 2, 1>, scalar_prefetch = 0 : i64, scratch_operands = 0 : i64, tpu.core_type = #tpu.core_type<tc>, window_params = [{transform_indices = @transform_0, window_bounds = array<i64: 8, 384>}, {transform_indices = @transform_1, window_bounds = array<i64: 384, 128>}, {transform_indices = @transform_2, window_bounds = array<i64: 1, 128>}, {transform_indices = @transform_3, window_bounds = array<i64: 8, 128>}]} {
    %c0 = arith.constant 0 : index
    %c0_0 = arith.constant 0 : index
    %0 = vector.load %arg2[%c0, %c0_0] : memref<8x384xbf16, #tpu.memory_space<vmem>>, vector<8x384xbf16>
    %c0_1 = arith.constant 0 : index
    %c0_2 = arith.constant 0 : index
    %1 = vector.load %arg3[%c0_1, %c0_2] : memref<384x128xbf16, #tpu.memory_space<vmem>>, vector<384x128xbf16>
    %cst = arith.constant dense<0.000000e+00> : vector<8x128xf32>
    %2 = tpu.matmul %0, %1, %cst {dimension_numbers = #tpu.dot_dimension_numbers<[1], [0], [0], [1], [0, 0, 1, 1], [], []>} : vector<8x384xbf16>, vector<384x128xbf16>, vector<8x128xf32> -> vector<8x128xf32>
    %c0_3 = arith.constant 0 : index
    %c0_4 = arith.constant 0 : index
    %3 = vector.load %arg4[%c0_3, %c0_4] : memref<1x128xf32, #tpu.memory_space<vmem>>, vector<1x128xf32>
    %4 = vector.broadcast %3 : vector<1x128xf32> to vector<8x128xf32>
    %5 = arith.addf %2, %4 : vector<8x128xf32>
    %c0_5 = arith.constant 0 : index
    %c0_6 = arith.constant 0 : index
    %6 = vector.load %arg5[%c0_5, %c0_6] : memref<8x128xf32, #tpu.memory_space<vmem>>, vector<8x128xf32>
    tpu.vector_store %arg5[%c0_5, %c0_6], %5 {strides = array<i32>} : memref<8x128xf32, #tpu.memory_space<vmem>>, vector<8x128xf32>,
    return
  }
  func.func @transform_0(%arg0: i32, %arg1: i32) -> (i32, i32) {
    %c0_i32 = arith.constant 0 : i32
    %c0_i32_0 = arith.constant 0 : i32
    return %arg0, %c0_i32 : i32, i32
  }
  func.func @transform_1(%arg0: i32, %arg1: i32) -> (i32, i32) {
    %c0_i32 = arith.constant 0 : i32
    %c0_i32_0 = arith.constant 0 : i32
    return %c0_i32, %arg1 : i32, i32
  }
  func.func @transform_2(%arg0: i32, %arg1: i32) -> (i32, i32) {
    %c0_i32 = arith.constant 0 : i32
    %c0_i32_0 = arith.constant 0 : i32
    return %c0_i32, %arg1 : i32, i32
  }
  func.func @transform_3(%arg0: i32, %arg1: i32) -> (i32, i32) {
    %c0_i32 = arith.constant 0 : i32
    return %arg0, %arg1 : i32, i32
  }
}

</mosaic_0001>

<bundles_post_ra>
// kernel: tpu_custom_call.1
= control target key start
LH: loop header
LB: loop body
LE: loop exit
PB: predicated region body
PF: predicated region fallthrough
CT: control target
= control target key end

     0   :  { %8 = vsyncpa [#allocation3], 0  ;;  %s1238_s0 = inlined_call_operand.hbm [shape: bf16[16,384], index: 0, kind: input, shape index: {}]   ;;  %s1239_s1 = inlined_call_operand.hbm [shape: bf16[384,128], index: 1, kind: input, shape index: {}]   ;;  %s1240_s2 = inlined_call_operand.vmem [shape: f32[1,128], index: 2, kind: input, shape index: {}]   ;;  %s1241_s3 = inlined_call_operand.hbm [shape: f32[16,128], index: 3, kind: output, shape index: {}]  }
   0x1   :  { %10 = vsyncpa [#allocation3 + $0x1], 0 }
   0x2   :  { %11 = vsyncpa [#allocation6], 0 }
   0x3   :  { %12 = vsyncpa [#allocation4], 0 }
   0x4   :  { %14 = vsyncpa [#allocation4 + $0x1], 0  ;;  %s1022_s12 = smov 0   ;;  %s1024_s13 = smov 0  }
   0x5   :  { %s1026_s14 = smov 0   ;;  %s1028_s15 = smov 0  }
   0x6   :  { %s1030_s16 = smov 0   ;;  %s1032_s17 = smov 0  }
   0x7 LB: > { %s649_s18 = sadd.s32 4294967295, %s993_s17   ;;  %s650_s19 = sadd.s32 4294967294, %s993_s17   ;;  %s993_s17 = sphi %s1032_s17, %s20_s17   ;;  %s989_s16 = sphi %s1030_s16, %s1264_s16   ;;  %s985_s15 = sphi %s1028_s15, %s1263_s15   ;;  %s981_s14 = sphi %s1026_s14, %s1262_s14   ;;  %s977_s13 = sphi %s1024_s13, %s1261_s13   ;;  %s973_s12 = sphi %s1022_s12, %s1260_s12  }
   0x8   : > { %p52_p0 = scmp.ne.s32.totalorder %s977_s13, %s973_s12  ;;  %p1056_p1 = scmp.eq.s32.totalorder %s649_s18, 0 }
   0x9   : > { %p1060_p2 = scmp.eq.s32.totalorder %s649_s18, 1  ;;  %p136_p3 = scmp.eq.s32.totalorder %s650_s19, 1 }
   0xa   : > { %s1246_s20 = scalar_select %p1056_p1, 1, 0 }
   0xb   : > { %s1247_s21 = scalar_select %p1060_p2, 1, 0 }
   0xc   : > { %p1066_p4 = por %p1056_p1, %p52_p0  ;;  %p651_p5 = scmp.ge.s32.totalorder %s993_s17, 1 }
   0xd   : > { %p1071_p6 = por %p136_p3, %p52_p0  ;;  %p143_p7 = scmp.lt.s32.totalorder %s993_s17, 3 }
   0xe   : > { %s1248_s22 = scalar_select %p1066_p4, 1, 0 }
   0xf   : > { %s1249_s23 = scalar_select %p1071_p6, 1, 0 }
  0x10   : > { %p1076_p8 = pnand %p651_p5, %p143_p7  ;;  %s995_s25 = smov [#allocation5]  }
  0x11   : > { %s157_s26 = sshll.u32 %s995_s25, 4  ;;  %s32_s28 = sadd.s32 1, %s989_s16  ;;  %s158_s26 = int_to_ptr.vmem [resolvable:$true] %s157_s26 }
  0x12   : > { %s1250_s24 = scalar_select %p1076_p8, 1, 0 }
  0x13   : > { %p753_p9 = pneg %p1076_p8  ;;  %s849_s4 = scalar_lea.hbm %s1239_s1, 3072 }
  0x14   : > { %p850_p12 = scmp.ne.s32.totalorder %s1239_s1, %s849_s4  ;;  %p856_p5 = scmp.lt.u32.totalorder %s849_s4, %s1239_s1 }
  0x15   : > { %p1085_p11 = pnand %p753_p9, %p1056_p1 }
  0x17   : > { %p851_p13 = pneg %p1085_p11 }
  0x19   : > { %p852_p0 = pnand %p851_p13, %p850_p12 }
  0x1b   : > { %p853_p3 = pneg %p852_p0 }
  0x1d   : > { %p858_p7 = pnand %p856_p5, %p853_p3 }
  0x1f   : > { %861 = shalt.err (!%p858_p7)
}
  0x20   : > { %s862_s9 = scalar_lea.vmem %s158_s26, 3072  ;;  %p870_p1 = scmp.lt.s32.totalorder %s158_s26, %s158_s26 }
  0x21   : > { %p863_p9 = scmp.ne.s32.totalorder %s158_s26, %s862_s9  ;;  %p871_p4 = scmp.lt.s32.totalorder %s862_s9, %s862_s9 }
  0x23   : > { %p865_p10 = pnand %p863_p9, %p851_p13  ;;  %p872_p8 = por %p871_p4, %p870_p1 }
  0x25   : > { %p866_p6 = pneg %p865_p10 }
  0x27   : > { %p873_p2 = pnand %p872_p8, %p866_p6 }
  0x29   : > { %876 = shalt.err (!%p873_p2)
}
  0x2a   : > { %s996_s10 = smov 64   ;;  %s997_s11 = smov 4  }
  0x2b   : > { %756 = dma.hbm_to_vmem [thread:$0]  (!%p1085_p11), %s1239_s1, 3072, %s158_s26, [#allocation6], %s996_s10, %s996_s10, %s997_s11  }
  0x2c   : > { %p34_p1 = scmp.ge.s32.totalorder %s32_s28, 2  ;;  %s39_s25 = sadd.s32 1, %s981_s14 }
  0x2d   : > { %p46_p2 = scmp.ne.s32.totalorder %s981_s14, %s977_s13  ;;  %p47_p4 = scmp.eq.s32.totalorder %s993_s17, 0 }
  0x2e   : > { %s1266_s28 = smov (%p34_p1, %s32_s28), 0  ;;  %p1252_p8 = scmp.ne.s32.totalorder %s1247_s21, 0 }
  0x2f   : > { %p48_p6 = por %p47_p4, %p46_p2  ;;  %s36_s30 = ssub.s32 %s989_s16, %s1266_s28 }
  0x30   : > { %p1114_p10 = por %p1252_p8, %p46_p2  ;;  %p766_p12 = scmp.lt.s32.totalorder %s993_s17, 2 }
  0x31   : > { %p37_p13 = scmp.eq.s32.totalorder %s36_s30, 0  ;;  %s177_s27 = sand.u32 1, %s981_s14  }
  0x32   : > { %s742_s4 = smul.u32 12, %s177_s27  ;;  %p1126_p11 = pnand %p766_p12, %p48_p6 }
  0x33   : > { %s1123_s5 = scalar_select %p37_p13, %s981_s14, %s39_s25  }
  0x34   : > { %s743_s26 = smul.u32 192, %s989_s16  ;;  %s181_s6 = scalar_lea.vmem [#allocation2], %s742_s4 }
  0x35   : > { %s189_s7 = sshll.u32 %s181_s6, 4  ;;  %s178_s11 = scalar_lea.sflag [#allocation3], %s177_s27  ;;  %s1135_s7 = int_to_ptr.vmem [resolvable:$true] %s189_s7 }
  0x36   : > { %s1133_s10 = scalar_lea.hbm %s1238_s0, %s743_s26  ;;  %p879_p3 = pneg %p1126_p11 }
  0x37   : > { %s877_s18 = scalar_lea.hbm %s1133_s10, 192  ;;  %s882_s30 = scalar_lea.hbm %s1238_s0, 384 }
  0x38   : > { %p878_p0 = scmp.ne.s32.totalorder %s1133_s10, %s877_s18  ;;  %p883_p9 = scmp.lt.u32.totalorder %s1133_s10, %s1238_s0 }
  0x39   : > { %p884_p1 = scmp.lt.u32.totalorder %s882_s30, %s877_s18  ;;  %p886_p4 = scmp.lt.u32.totalorder %s877_s18, %s1133_s10 }
  0x3a   : > { %p880_p5 = pnand %p879_p3, %p878_p0 }
  0x3b   : > { %p885_p2 = por %p884_p1, %p883_p9 }
  0x3c   : > { %p881_p7 = pneg %p880_p5 }
  0x3d   : > { %p887_p6 = por %p886_p4, %p885_p2 }
  0x3f   : > { %p888_p8 = pnand %p887_p6, %p881_p7 }
  0x41   : > { %891 = shalt.err (!%p888_p8)
}
  0x42   : > { %s892_s27 = scalar_lea.vmem %s1135_s7, 192  ;;  %s998_s6 = smov [#allocation2]  }
  0x43   : > { %p893_p12 = scmp.ne.s32.totalorder %s1135_s7, %s892_s27  ;;  %s897_s9 = sshll.u32 %s998_s6, 4  ;;  %s898_s9 = int_to_ptr.vmem [resolvable:$false] %s897_s9 }
  0x44   : > { %s899_s21 = scalar_lea.vmem %s898_s9, 384  ;;  %p900_p5 = scmp.lt.s32.totalorder %s1135_s7, %s898_s9 }
  0x45   : > { %p895_p13 = pnand %p893_p12, %p879_p3  ;;  %p901_p9 = scmp.lt.s32.totalorder %s899_s21, %s892_s27 }
  0x47   : > { %p896_p0 = pneg %p895_p13  ;;  %p902_p1 = por %p901_p9, %p900_p5 }
  0x49   : > { %p903_p2 = pnand %p902_p1, %p896_p0 }
  0x4b   : > { %906 = shalt.err (!%p903_p2)
}
  0x4c   : > { %760 = dma.hbm_to_vmem [thread:$0]  (!%p1126_p11), %s1133_s10, 192, %s1135_s7, %s178_s11  }
  0x4d   : > { %p1255_p7 = scmp.ne.s32.totalorder %s1250_s24, 0 }
  0x4e   : > { %s1165_s18 = sand.u32 (!%p1255_p7), 1, %s977_s13   ;;  %p1256_p3 = scmp.ne.s32.totalorder (!%p1255_p7), %s1248_s22, 0 }
  0x4f   : > { %198 = sbr.rel (%p1255_p7) target bundleno = 357 (0x165), region = 32  ;;  %s201_s25 = scalar_lea.sflag (!%p1255_p7), [#allocation3], %s1165_s18 }
  0x50   : > { %s744_s19 = smul.u32 (!%p1255_p7), 12, %s1165_s18 }
  0x52   : > { %s1169_s30 = scalar_lea.vmem (!%p1255_p7), [#allocation2], %s744_s19 }
  0x56   : > { %960 = dma.done.wait (%p1256_p3), %s201_s25, 192  }
  0x57   : > { %962 = vsyncadd (%p1256_p3), %s201_s25, 4294967104  ;;  %p1257_p11 = scmp.ne.s32.totalorder %s1246_s20, 0 }
  0x59   : > { %964 = dma.done.wait (%p1257_p11), [#allocation6], 3072  }
  0x5a   : > { %966 = vsyncadd (%p1257_p11), [#allocation6], 4294964224  ;;  %v999_v0 = vmov 0.0   ;;  %vm1000_vm0 = vmmov 0   ;;  %v822_v1 = vld [vmem:[#allocation5 + $0x40] sm:$0xff]   ;;  %v825_v4 = vld [vmem:[#allocation5 + $0x48] sm:$0xff]  }
  0x5b   : > { %722 = vmatprep.subr.bf16.mxu1 %v999_v0  ;;  %738 = vmatprep.mubr.msk.bf16.mxu1 %vm1000_vm0, %v999_v0  ;;  %v823_v2 = vld [vmem:[#allocation5] sm:$0xff]   ;;  %v826_v5 = vld [vmem:[#allocation5 + $0x8] sm:$0xff]   ;;  %v828_v7 = vld [vmem:[#allocation5 + $0x50] sm:$0xff]   ;;  %s658_s20 = sshll.u32 %s1165_s18, 3  ;;  %s688_s7 = sshll.u32 %s985_s15, 7 }
  0x5c   : > { %691 = vmatprep.subr.bf16.mxu0 %v822_v1  ;;  %v824_v3 = vld [vmem:[#allocation5 + $0x80] sm:$0xff]   ;;  %v827_v6 = vld [vmem:[#allocation5 + $0x88] sm:$0xff]   ;;  %v829_v8 = vld [vmem:[#allocation5 + $0x10] sm:$0xff]   ;;  %s233_s8 = scalar_lea.vmem [#allocation7], %s658_s20  ;;  %s1189_s26 = scalar_lea.hbm %s1241_s3, %s688_s7 }
  0x5d   : > { %692 = vmatpush3.bf16.msra.mxu0 %v823_v2  ;;  %723 = vmatpush3.bf16.msra.mxu1 %v824_v3  ;;  %v830_v9 = vld [vmem:[#allocation5 + $0x90] sm:$0xff]   ;;  %v831_v10 = vld [vmem:[#allocation5 + $0x58] sm:$0xff]   ;;  %v834_v13 = vld [vmem:[#allocation5 + $0x60] sm:$0xff]   ;;  %s546_s10 = sshll.u32 %s233_s8, 4  ;;  %s532_s27 = scalar_lea.sflag [#allocation4], %s1165_s18  ;;  %s1191_s10 = int_to_ptr.vmem [resolvable:$true] %s546_s10 }
  0x5e   : > { %693 = vmatprep.subr.bf16.mxu0 %v825_v4  ;;  %724 = vmatprep.subr.bf16.mxu1 %v999_v0  ;;  %v832_v11 = vld [vmem:[#allocation5 + $0x18] sm:$0xff]   ;;  %v835_v14 = vld [vmem:[#allocation5 + $0x20] sm:$0xff]   ;;  %v837_v16 = vld [vmem:[#allocation5 + $0x68] sm:$0xff]   ;;  %s907_s6 = scalar_lea.vmem %s1191_s10, 128  ;;  %s1001_s15 = smov [#allocation7]  }
  0x5f   : > { %v833_v12 = vld [vmem:[#allocation5 + $0x98] sm:$0xff]   ;;  %v836_v15 = vld [vmem:[#allocation5 + $0xa0] sm:$0xff]   ;;  %v838_v17 = vld [vmem:[#allocation5 + $0x28] sm:$0xff]   ;;  %p908_p4 = scmp.ne.s32.totalorder %s1191_s10, %s907_s6  ;;  %s911_s9 = sshll.u32 %s1001_s15, 4  ;;  %s912_s9 = int_to_ptr.vmem [resolvable:$false] %s911_s9 }
  0x60   : > { %v839_v18 = vld [vmem:[#allocation5 + $0xa8] sm:$0xff]   ;;  %v840_v19 = vld [vmem:[#allocation5 + $0x70] sm:$0xff]   ;;  %v843_v23 = vld [vmem:[#allocation5 + $0x78] sm:$0xff]   ;;  %s913_s21 = scalar_lea.vmem %s912_s9, 256  ;;  %p914_p12 = scmp.lt.s32.totalorder %s1191_s10, %s912_s9 }
  0x61   : > { %694 = vmatpush3.bf16.msra.mxu0 %v826_v5  ;;  %725 = vmatpush3.bf16.msra.mxu1 %v827_v6  ;;  %v841_v20 = vld [vmem:[#allocation5 + $0x30] sm:$0xff]   ;;  %v844_v25 = vld [vmem:[#allocation5 + $0x38] sm:$0xff]   ;;  %v659_v31 = vld [vmem:[%s1240_s2] ss:$0 sm:$0xff]  ;;  %p909_p6 = pnand %p908_p4, %p1114_p10  ;;  %p915_p13 = scmp.lt.s32.totalorder %s913_s21, %s907_s6 }
  0x62   : > { %695 = vmatprep.subr.bf16.mxu0 %v828_v7  ;;  %726 = vmatprep.subr.bf16.mxu1 %v999_v0  ;;  %v238_v21 = vld [vmem:[%s1169_s30] sm:$0xff]  ;;  %v848_v28 = vld [vmem:[%s1169_s30 + $0x8] ss:$0 sps:$4 sm:$0xff]  }
  0x63   : > { %v842_v22 = vld [vmem:[#allocation5 + $0xb0] sm:$0xff]   ;;  %v661_v24 = vcombine.high %v238_v21, %v238_v21  ;;  %v847_v26 = vld [vmem:[#allocation5 + $0xb8] sm:$0xff]   ;;  %v660_v27 = vcombine.low %v238_v21, %v238_v21  ;;  %p910_p8 = pneg %p909_p6  ;;  %p916_p0 = por %p915_p13, %p914_p12 }
  0x65   : > { %696 = vmatpush3.bf16.msra.mxu0 %v829_v8  ;;  %727 = vmatpush3.bf16.msra.mxu1 %v830_v9  ;;  %p917_p5 = pnand %p916_p0, %p910_p8 }
  0x66   : > { %697 = vmatprep.subr.bf16.mxu0 %v831_v10  ;;  %728 = vmatprep.subr.bf16.mxu1 %v999_v0 }
  0x67   : > { %482 = vmatprep.mubr.bf16.mxu0 %v661_v24 }
  0x69   : > { %698 = vmatpush3.bf16.msra.mxu0 %v832_v11  ;;  %729 = vmatpush3.bf16.msra.mxu1 %v833_v12 }
  0x6a   : > { %699 = vmatprep.subr.bf16.mxu0 %v834_v13  ;;  %730 = vmatprep.subr.bf16.mxu1 %v999_v0 }
  0x6d   : > { %700 = vmatpush3.bf16.msra.mxu0 %v835_v14  ;;  %731 = vmatpush3.bf16.msra.mxu1 %v836_v15 }
  0x6e   : > { %701 = vmatprep.subr.bf16.mxu0 %v837_v16  ;;  %732 = vmatprep.subr.bf16.mxu1 %v999_v0 }
  0x71   : > { %702 = vmatpush3.bf16.msra.mxu0 %v838_v17  ;;  %733 = vmatpush3.bf16.msra.mxu1 %v839_v18 }
  0x72   : > { %703 = vmatprep.subr.bf16.mxu0 %v840_v19  ;;  %734 = vmatprep.subr.bf16.mxu1 %v999_v0 }
  0x75   : > { %704 = vmatpush3.bf16.msra.mxu0 %v841_v20  ;;  %735 = vmatpush3.bf16.msra.mxu1 %v842_v22 }
  0x76   : > { %705 = vmatprep.subr.bf16.mxu0 %v843_v23  ;;  %736 = vmatprep.subr.bf16.mxu1 %v999_v0 }
  0x79   : > { %706 = vmatpush3.bf16.msra.mxu0 %v844_v25  ;;  %737 = vmatpush3.bf16.msra.mxu1 %v847_v26 }
  0x7c   : > { %483 = vmatmul.mubr.bf16.vlgmr.msra.gmra.mrb[0].mxu0 %v660_v27  ;;  %739 = vmatmul.mubr.bf16.vlgmr.msra.gmra.mrb[0].mxu1 %v848_v28 }
 0x14f   : > { %v707_v29 = vpop.f32.mrb[0].mxu0  ;;  %v524_v32 = vpop.f32.mrb[0].mxu1 }
 0x150   : > { %v708_v30 = vpop.f32.mrb[1].mxu0  ;;  %v740_v35 = vpop.f32.mrb[1].mxu1 }
 0x151   : > { %v709_v33 = vadd.f32 %v708_v30, %v707_v29  ;;  %v710_v34 = vpop.f32.mrb[2].mxu0  ;;  %v527_v37 = vpop.f32.mrb[2].mxu1 }
 0x152   : > { %v711_v36 = vpop.f32.mrb[3].mxu0  ;;  %v741_v39 = vpop.f32.mrb[3].mxu1 }
 0x153   : > { %v485_v38 = vadd.f32 %v709_v33, %v659_v31 }
 0x155   : > { %v525_v40 = vadd.f32 %v524_v32, %v485_v38 }
 0x157   : > { %530 = vst [vmem:[%s233_s8] sm:$0xff] %v525_v40 }
 0x158   : > { %920 = shalt.err (!%p917_p5)
}
 0x159   : > { %s921_s18 = scalar_lea.hbm %s1189_s26, 128  ;;  %s925_s30 = scalar_lea.hbm %s1241_s3, 256 }
 0x15a   : > { %p922_p9 = scmp.ne.s32.totalorder %s1189_s26, %s921_s18  ;;  %p926_p7 = scmp.lt.u32.totalorder %s1189_s26, %s1241_s3 }
 0x15b   : > { %p927_p3 = scmp.lt.u32.totalorder %s925_s30, %s921_s18  ;;  %p929_p4 = scmp.lt.u32.totalorder %s921_s18, %s1189_s26 }
 0x15c   : > { %p923_p1 = pnand %p922_p9, %p1114_p10 }
 0x15d   : > { %p928_p11 = por %p927_p3, %p926_p7 }
 0x15e   : > { %p924_p2 = pneg %p923_p1 }
 0x15f   : > { %p930_p6 = por %p929_p4, %p928_p11 }
 0x161   : > { %p931_p8 = pnand %p930_p6, %p924_p2 }
 0x163   : > { %934 = shalt.err (!%p931_p8)
}
 0x164   : > { %751 = dma.vmem_to_hbm [thread:$0]  (%p1114_p10), %s1191_s10, 128, %s1189_s26, %s532_s27  }
 0x165 PF: > { %s558_s24 = sand.u32 1, %s973_s12   ;;  %p1258_p12 = scmp.ne.s32.totalorder %s1249_s23, 0 }
 0x166   : > { %p1259_p13 = scmp.ge.s32.totalorder %s993_s17, 2  ;;  %s559_s7 = scalar_lea.sflag [#allocation4], %s558_s24 }
 0x168   : > { %p762_p0 = pnand %p1259_p13, %p1258_p12 }
 0x16a   : > { %968 = dma.done.wait (!%p762_p0), %s559_s7, 128  }
 0x16b   : > { %970 = vsyncadd (!%p762_p0), %s559_s7, 4294967168  ;;  %s20_s17 = sadd.s32 1, %s993_s17   ;;  %s1260_s12 = smov %s977_s13 }
 0x16c   : > { %p17_p5 = scmp.ge.s32.totalorder %s20_s17, 4   ;;  %s1261_s13 = smov %s981_s14 }
 0x16d   : > { %s1262_s14 = smov %s1123_s5  ;;  %s1263_s15 = smov %s989_s16 }
 0x16e   : > { %s1264_s16 = smov %s1266_s28  ;;  %19 = sbr.rel (!%p17_p5) target bundleno = 7 (0x7), region = 85 }
 0x175   :  { %564 = vsyncpa [#allocation3], 1 }
 0x176   :  { %566 = vsyncpa [#allocation3 + $0x1], 1 }
 0x177   :  { %567 = vsyncpa [#allocation6], 1 }
 0x178   :  { %568 = vsyncpa [#allocation4], 1 }
 0x179   :  { %570 = vsyncpa [#allocation4 + $0x1], 1 }

</bundles_post_ra>
